<compile_context>
chip_gen: v7x
topology: tpu7x:2x2x1
jax: 0.10.0
libtpu: 0.0.40
codegen_flags: <defaults>
</compile_context>

<pallas_src>
import functools

import jax
import jax.numpy as jnp
from jax.experimental import pallas as pl
from jax.experimental.pallas import tpu as pltpu


# ---------------------------------------------------------------------------
# Quantization helpers
# ---------------------------------------------------------------------------

IN_SCALE, IN_ZP = 0.0472, 64       # torch.quantize_per_tensor args in forward()
OUT_SCALE, OUT_ZP = 1.0, 0         # nnq.Conv2d / nnq.Linear default output qparams


def fake_quant_dequant(x, scale, zp):
    """Glue-side fake quantization (quint8 simulate)."""
    q = jnp.clip(jnp.round(x / scale) + zp, 0.0, 255.0)
    return (q - zp) * scale


def _requant_val(y, scale, zp):
    """In-kernel requantize epilogue (same math as fake_quant_dequant)."""
    q = jnp.clip(jnp.round(y / scale) + zp, 0.0, 255.0)
    return (q - zp) * scale


# ---------------------------------------------------------------------------
# ReLU6 (quantize + clamp + dequant fused into one elementwise kernel)
# ---------------------------------------------------------------------------

def _quant_relu6_kernel(x_ref, o_ref, *, scale, zp, q_hi):
    # quantize to the quint8 grid and apply quantized ReLU6 in one pass:
    # clamp q to [zp, q_hi] (zp >= 0 and q_hi <= 255 make the quantize clip
    # redundant), then dequantize.
    q = jnp.round(x_ref[...] / scale) + zp
    q = jnp.clip(q, float(zp), float(q_hi))
    o_ref[...] = (q - zp) * scale


def quant_relu6_pallas(x, scale=IN_SCALE, zp=IN_ZP):
    """Fused fake-quant + quantized ReLU6 over an arbitrary-shape f32 array."""
    orig_shape = x.shape
    flat = x.reshape(-1)
    n = flat.shape[0]
    lane = 128
    rows = -(-n // lane)
    row_block = min(1024, max(8, -(-rows // 8) * 8))
    rows_p = -(-rows // row_block) * row_block
    total = rows_p * lane
    if total == n:
        buf = flat.reshape(rows_p, lane)          # no pad copy needed
    else:
        buf = jnp.zeros((total,), flat.dtype).at[:n].set(flat).reshape(rows_p, lane)
    q_hi = min(round(6.0 / scale) + zp, 255)
    out = pl.pallas_call(
        functools.partial(_quant_relu6_kernel, scale=scale, zp=zp, q_hi=q_hi),
        out_shape=jax.ShapeDtypeStruct((rows_p, lane), jnp.float32),
        grid=(rows_p // row_block,),
        in_specs=[pl.BlockSpec((row_block, lane), lambda i: (i, 0))],
        out_specs=pl.BlockSpec((row_block, lane), lambda i: (i, 0)),
        compiler_params=pltpu.CompilerParams(dimension_semantics=("parallel",)),
    )(buf)
    return out.reshape(-1)[:n].reshape(orig_shape)


# ---------------------------------------------------------------------------
# Fused matmul (bf16 MXU, f32 acc) + bias + requant
# ---------------------------------------------------------------------------

def _matmul_kernel(a_ref, b_ref, bias_ref, o_ref, acc_ref, *, out_scale, out_zp):
    k = pl.program_id(2)

    @pl.when(k == 0)
    def _():
        acc_ref[...] = jnp.zeros_like(acc_ref)

    acc_ref[...] += jnp.dot(a_ref[...], b_ref[...],
                            preferred_element_type=jnp.float32)

    # Write the output exactly once, with bias + requant fused in the epilogue.
    @pl.when(k == pl.num_programs(2) - 1)
    def _():
        y = acc_ref[...] + bias_ref[...]
        o_ref[...] = _requant_val(y, out_scale, out_zp).astype(o_ref.dtype)


def matmul_bias_requant_pallas(a, b, bias, out_scale=OUT_SCALE, out_zp=OUT_ZP):
    """Tiled bf16 matmul (MXU, f32 accumulation) with fused bias + requant."""
    M, K = a.shape
    _, N = b.shape
    a = a.astype(jnp.bfloat16)
    b = b.astype(jnp.bfloat16)

    # Tile selection: larger tiles -> fewer grid steps, better MXU residency.
    if M >= 256:
        tm = 256
    elif M >= 128:
        tm = 128
    else:
        tm = max(16, -(-M // 16) * 16)           # bf16-friendly sublane multiple
    tn = 512 if N >= 512 else (256 if N >= 256 else 128)
    tk = 512 if K >= 512 else (256 if K >= 256 else 128)

    Mp = -(-M // tm) * tm
    Kp = -(-K // tk) * tk
    Np = -(-N // tn) * tn

    a_p = a if (Mp == M and Kp == K) else (
        jnp.zeros((Mp, Kp), a.dtype).at[:M, :K].set(a))
    b_p = b if (Kp == K and Np == N) else (
        jnp.zeros((Kp, Np), b.dtype).at[:K, :N].set(b))
    bias_p = bias.astype(jnp.float32)
    if Np != N:
        bias_p = jnp.zeros((Np,), jnp.float32).at[:N].set(bias_p)
    bias_p = bias_p.reshape(1, Np)

    out = pl.pallas_call(
        functools.partial(_matmul_kernel, out_scale=out_scale, out_zp=out_zp),
        out_shape=jax.ShapeDtypeStruct((Mp, Np), jnp.float32),
        grid_spec=pltpu.PrefetchScalarGridSpec(
            num_scalar_prefetch=0,
            grid=(Mp // tm, Np // tn, Kp // tk),
            in_specs=[pl.BlockSpec((tm, tk), lambda i, j, k: (i, k)),
                      pl.BlockSpec((tk, tn), lambda i, j, k: (k, j)),
                      pl.BlockSpec((1, tn), lambda i, j, k: (0, j))],
            out_specs=pl.BlockSpec((tm, tn), lambda i, j, k: (i, j)),
            scratch_shapes=[pltpu.VMEM((tm, tn), jnp.float32)]),
        compiler_params=pltpu.CompilerParams(
            dimension_semantics=("parallel", "parallel", "arbitrary")),
    )(a_p, b_p, bias_p)
    return out[:M, :N]


# ---------------------------------------------------------------------------
# Depthwise 3x3 conv (bias + requant fused, bf16 activations, f32 accumulate)
# ---------------------------------------------------------------------------

def _dwconv_s1_kernel(x_ref, w_ref, b_ref, o_ref, *, out_scale, out_zp):
    # x_ref: (1, H+2, W+2, C) padded bf16 input (one batch element)
    # w_ref: (3, 3, C) f32, b_ref: (1, C) f32, o_ref: (1, H, W, C) f32
    x = x_ref[0]
    w = w_ref[...]
    H, W = o_ref.shape[1], o_ref.shape[2]
    acc = jnp.zeros(o_ref.shape[1:], jnp.float32)
    for kh in range(3):
        for kw in range(3):
            acc = acc + x[kh:kh + H, kw:kw + W, :] * w[kh, kw]
    y = acc + b_ref[0]
    o_ref[0] = _requant_val(y, out_scale, out_zp)


def _dwconv_s2_kernel(x00_ref, x01_ref, x10_ref, x11_ref, w_ref, b_ref, o_ref,
                      *, out_scale, out_zp):
    # Parity-decomposed stride-2 depthwise 3x3: each x{pq}_ref holds the padded
    # input rows/cols of parity (p, q), shape (1, Ho+1, Wo+1, C).  Output pixel
    # (i, j) tap (kh, kw) reads x[kh%2][kw%2][i + kh//2, j + kw//2] — only
    # contiguous slices in the kernel, no wasted stride-1 compute.
    Ho, Wo = o_ref.shape[1], o_ref.shape[2]
    w = w_ref[...]
    parts = ((x00_ref[0], x01_ref[0]), (x10_ref[0], x11_ref[0]))
    acc = jnp.zeros(o_ref.shape[1:], jnp.float32)
    for kh in range(3):
        for kw in range(3):
            src = parts[kh % 2][kw % 2]
            i0, j0 = kh // 2, kw // 2
            acc = acc + src[i0:i0 + Ho, j0:j0 + Wo, :] * w[kh, kw]
    y = acc + b_ref[0]
    o_ref[0] = _requant_val(y, out_scale, out_zp)


def dwconv3x3_pallas(x_nhwc, w, b, stride, out_scale=OUT_SCALE, out_zp=OUT_ZP):
    """Depthwise 3x3 conv, padding=1, stride 1 or 2, bias+requant fused."""
    # TODO(synk): for full-size 112x112 images, tile H into row strips and pack
    # small channel counts (C<128) into dense lanes to avoid masked stores.
    N, H, W, C = x_nhwc.shape
    # bf16 activations halve the HBM bytes of this memory-bound op; weights and
    # the accumulator stay f32.
    xp = jnp.pad(x_nhwc, ((0, 0), (1, 1), (1, 1), (0, 0))).astype(jnp.bfloat16)
    w = w.astype(jnp.float32)
    cparams = pltpu.CompilerParams(dimension_semantics=("parallel",))

    if stride == 1:
        out = pl.pallas_call(
            functools.partial(_dwconv_s1_kernel, out_scale=out_scale,
                              out_zp=out_zp),
            out_shape=jax.ShapeDtypeStruct((N, H, W, C), jnp.float32),
            grid=(N,),
            in_specs=[pl.BlockSpec((1, H + 2, W + 2, C),
                                   lambda n: (n, 0, 0, 0)),
                      pl.BlockSpec((3, 3, C), lambda n: (0, 0, 0)),
                      pl.BlockSpec((1, C), lambda n: (0, 0))],
            out_specs=pl.BlockSpec((1, H, W, C), lambda n: (n, 0, 0, 0)),
            compiler_params=cparams,
        )(xp, w, b.reshape(1, C))
        return out

    # stride 2: parity decomposition in glue (fused into one XLA pass under
    # jit), contiguous slices inside the kernel.
    Ho = (H + 2 - 3) // 2 + 1
    Wo = (W + 2 - 3) // 2 + 1

    def parity(r0, c0):
        t = xp[:, r0::2, c0::2, :][:, :Ho + 1, :Wo + 1, :]
        pr = Ho + 1 - t.shape[1]
        pc = Wo + 1 - t.shape[2]
        if pr or pc:
            t = jnp.pad(t, ((0, 0), (0, pr), (0, pc), (0, 0)))
        return t

    x00, x01, x10, x11 = parity(0, 0), parity(0, 1), parity(1, 0), parity(1, 1)
    pspec = pl.BlockSpec((1, Ho + 1, Wo + 1, C), lambda n: (n, 0, 0, 0))
    out = pl.pallas_call(
        functools.partial(_dwconv_s2_kernel, out_scale=out_scale,
                          out_zp=out_zp),
        out_shape=jax.ShapeDtypeStruct((N, Ho, Wo, C), jnp.float32),
        grid=(N,),
        in_specs=[pspec, pspec, pspec, pspec,
                  pl.BlockSpec((3, 3, C), lambda n: (0, 0, 0)),
                  pl.BlockSpec((1, C), lambda n: (0, 0))],
        out_specs=pl.BlockSpec((1, Ho, Wo, C), lambda n: (n, 0, 0, 0)),
        compiler_params=cparams,
    )(x00, x01, x10, x11, w, b.reshape(1, C))
    return out


# ---------------------------------------------------------------------------
# Conv / linear wrappers built on the fused Pallas matmul
# ---------------------------------------------------------------------------

def conv1x1_pallas(x_nhwc, w, b):
    N, H, W, Cin = x_nhwc.shape
    Cout = w.shape[1]
    y = matmul_bias_requant_pallas(x_nhwc.reshape(N * H * W, Cin), w, b)
    return y.reshape(N, H, W, Cout)


def conv3x3_pallas(x_nhwc, w, b, stride):
    """Full 3x3 conv, padding=1, via bf16 im2col + fused Pallas matmul."""
    # TODO(synk): feed the 9 taps via the matmul's input index_map instead of
    # materializing the im2col matrix in HBM (bf16 already halves its bytes).
    N, H, W, Cin = x_nhwc.shape
    Cout = w.shape[3]
    Ho = (H + 2 - 3) // stride + 1
    Wo = (W + 2 - 3) // stride + 1
    xp = jnp.pad(x_nhwc, ((0, 0), (1, 1), (1, 1), (0, 0))).astype(jnp.bfloat16)
    patches = []
    for kh in range(3):
        for kw in range(3):
            patches.append(
                xp[:, kh:kh + stride * Ho:stride, kw:kw + stride * Wo:stride, :])
    pmat = jnp.concatenate(patches, axis=-1).reshape(N * Ho * Wo, 9 * Cin)
    wmat = w.reshape(9 * Cin, Cout).astype(jnp.bfloat16)
    y = matmul_bias_requant_pallas(pmat, wmat, b)
    return y.reshape(N, Ho, Wo, Cout)


def linear_pallas(x, w, b):
    # TODO(synk): an int8-weight MXU path on v5e/v6e would further cut the
    # weight-bandwidth-bound Linear; v7x MXU has no int path so keep bf16.
    return matmul_bias_requant_pallas(x, w, b)


# ---------------------------------------------------------------------------
# Full OP0..OP84 configuration (spatial dims scaled for the demo)
# ---------------------------------------------------------------------------

def _build_cfg(batch_size, spatial):
    """Mirror every OP{i} of the reference module; spatial dims are scaled by
    spatial/112 (original net uses 224/112/56/28/14/7)."""
    B = batch_size

    def sc(v):
        return max(1, (v * spatial) // 112)

    cfg = {}

    relu = {1: (32, 112), 3: (32, 112), 6: (96, 112), 8: (96, 56),
            11: (144, 56), 13: (144, 56), 16: (144, 56), 18: (144, 28),
            21: (192, 28), 25: (192, 28), 27: (192, 28), 30: (192, 28),
            32: (192, 14), 35: (384, 14), 37: (384, 14), 40: (384, 14),
            42: (384, 14), 45: (384, 14), 47: (384, 14), 50: (384, 14),
            52: (384, 14), 55: (576, 14), 57: (576, 14), 60: (576, 14),
            62: (576, 14), 65: (576, 14), 67: (576, 7), 70: (960, 7),
            72: (960, 7), 75: (960, 7), 79: (960, 7), 81: (960, 7)}
    for i, (c, sp) in relu.items():
        cfg[i] = dict(kind="relu6", shape=(B, c, sc(sp), sc(sp)))

    cfg[0] = dict(kind="conv3x3", cin=3, cout=32, stride=2,
                  shape=(B, 3, sc(224), sc(224)))

    dw = {2: (32, 1, 112), 7: (96, 2, 112), 12: (144, 1, 56), 17: (144, 2, 56),
          22: (192, 1, 28), 26: (192, 1, 28), 31: (192, 2, 28),
          36: (384, 1, 14), 41: (384, 1, 14), 46: (384, 1, 14),
          51: (384, 1, 14), 56: (576, 1, 14), 61: (576, 1, 14),
          66: (576, 2, 14), 71: (960, 1, 7), 76: (960, 1, 7), 80: (960, 1, 7)}
    for i, (c, st, sp) in dw.items():
        cfg[i] = dict(kind="dwconv", c=c, stride=st, shape=(B, c, sc(sp), sc(sp)))

    pw = {4: (32, 16, 112), 5: (16, 96, 112), 9: (96, 24, 56),
          10: (24, 144, 56), 14: (144, 24, 56), 15: (24, 144, 56),
          19: (144, 32, 28), 20: (32, 192, 28), 23: (192, 32, 56),
          24: (32, 192, 28), 28: (192, 32, 28), 29: (32, 192, 28),
          33: (192, 64, 14), 34: (64, 384, 14), 38: (384, 64, 14),
          39: (64, 384, 14), 43: (384, 64, 14), 44: (64, 384, 14),
          48: (384, 64, 14), 49: (64, 384, 14), 53: (384, 96, 14),
          54: (96, 576, 14), 58: (576, 96, 14), 59: (96, 576, 14),
          63: (576, 96, 14), 64: (96, 576, 14), 68: (576, 160, 7),
          69: (160, 960, 7), 73: (960, 160, 7), 74: (160, 960, 7),
          77: (960, 160, 7), 78: (160, 960, 7), 82: (960, 320, 7),
          83: (320, 1280, 7)}
    for i, (ci, co, sp) in pw.items():
        cfg[i] = dict(kind="conv1x1", cin=ci, cout=co, shape=(B, ci, sc(sp), sc(sp)))

    cfg[84] = dict(kind="linear", cin=1280, cout=1000, shape=(B, 1280))
    return cfg


# ---------------------------------------------------------------------------
# Module wrapper
# ---------------------------------------------------------------------------

class MobileNetv2Pallas:
    """forward(i) mirrors the PyTorch module: build a random quantized input of
    shape x{i} and run OP{i}.  Spatial dims are scaled down for a quick demo."""

    def __init__(self, batch_size=2, spatial=16):
        self.cfg = _build_cfg(batch_size, spatial)
        self._params = {}      # lazily created per op index
        self._compiled = {}    # cached jitted per-op functions

    # -- parameters --------------------------------------------------------
    def _get_params(self, i):
        if i in self._params:
            return self._params[i]
        cfg = self.cfg[i]
        kind = cfg["kind"]
        key = jax.random.PRNGKey(1000 + i)
        if kind == "relu6":
            p = {}
        elif kind == "conv3x3":
            p = {"w": 0.05 * jax.random.normal(
                     key, (3, 3, cfg["cin"], cfg["cout"]), jnp.float32),
                 "b": jnp.zeros((cfg["cout"],), jnp.float32)}
        elif kind == "dwconv":
            p = {"w": 0.05 * jax.random.normal(key, (3, 3, cfg["c"]), jnp.float32),
                 "b": jnp.zeros((cfg["c"],), jnp.float32)}
        elif kind in ("conv1x1", "linear"):
            p = {"w": 0.05 * jax.random.normal(
                     key, (cfg["cin"], cfg["cout"]), jnp.float32),
                 "b": jnp.zeros((cfg["cout"],), jnp.float32)}
        else:
            raise ValueError(kind)
        self._params[i] = p
        return p

    # -- jitted per-op path (quant + layout glue + Pallas call fused) -------
    def _get_op(self, i):
        if i in self._compiled:
            return self._compiled[i]
        cfg = self.cfg[i]
        kind = cfg["kind"]

        if kind == "relu6":
            def fn(x):
                # quantize + quantized ReLU6 + dequant fused in one kernel
                return quant_relu6_pallas(x, IN_SCALE, IN_ZP)
        elif kind == "linear":
            def fn(x, w, b):
                x = fake_quant_dequant(x, IN_SCALE, IN_ZP)
                return linear_pallas(x, w, b)
        elif kind == "conv3x3":
            stride = cfg["stride"]

            def fn(x, w, b):
                x = fake_quant_dequant(x, IN_SCALE, IN_ZP)
                x = jnp.transpose(x, (0, 2, 3, 1))          # NCHW -> NHWC
                y = conv3x3_pallas(x, w, b, stride)
                return jnp.transpose(y, (0, 3, 1, 2))       # NHWC -> NCHW
        elif kind == "dwconv":
            stride = cfg["stride"]

            def fn(x, w, b):
                x = fake_quant_dequant(x, IN_SCALE, IN_ZP)
                x = jnp.transpose(x, (0, 2, 3, 1))
                y = dwconv3x3_pallas(x, w, b, stride)
                return jnp.transpose(y, (0, 3, 1, 2))
        elif kind == "conv1x1":
            def fn(x, w, b):
                x = fake_quant_dequant(x, IN_SCALE, IN_ZP)
                x = jnp.transpose(x, (0, 2, 3, 1))
                y = conv1x1_pallas(x, w, b)
                return jnp.transpose(y, (0, 3, 1, 2))
        else:
            raise ValueError(kind)

        fn = jax.jit(fn)
        self._compiled[i] = fn
        return fn

    # -- forward ------------------------------------------------------------
    def forward(self, i, key):
        if i not in self.cfg:
            print("no {}".format(i))
            return None
        cfg = self.cfg[i]
        # torch.rand(x{i}); quantize_per_tensor(scale=0.0472, zp=64) happens
        # inside the jitted op (fused with the layout glue / kernel).
        x = jax.random.uniform(key, cfg["shape"], dtype=jnp.float32)
        fn = self._get_op(i)
        if cfg["kind"] == "relu6":
            return fn(x)
        p = self._get_params(i)
        return fn(x, p["w"], p["b"])


# ---------------------------------------------------------------------------

if __name__ == "__main__":
    key = jax.random.PRNGKey(0)
    model = MobileNetv2Pallas(batch_size=2, spatial=16)
    # Representative indices covering every structural family:
    #   0  : full 3x3 conv, stride 2 (im2col + MXU matmul)
    #   1  : ReLU6
    #   2  : depthwise 3x3, stride 1            7/17 : depthwise 3x3, stride 2
    #   4/33: 1x1 (pointwise) conv               84  : Linear
    for idx in [0, 1, 2, 4, 7, 17, 33, 84]:
        key, sub = jax.random.split(key)
        out = model.forward(idx, sub)
        out = jax.block_until_ready(out)
        assert jnp.all(jnp.isfinite(out)), "non-finite output for OP{}".format(idx)
    print("KERNEL_OK")
</pallas_src>

<mosaic_0001>
module attributes {stable_mosaic.version = 11 : i64} {
  func.func @_matmul_kernel(%arg0: i32, %arg1: i32, %arg2: i32, %arg3: memref<256x128xbf16, #tpu.memory_space<vmem>>, %arg4: memref<128x128xbf16, #tpu.memory_space<vmem>>, %arg5: memref<1x128xf32, #tpu.memory_space<vmem>>, %arg6: memref<256x128xf32, #tpu.memory_space<vmem>>, %arg7: memref<256x128xf32, #tpu.memory_space<vmem>>) attributes {dimension_semantics = [#tpu.dimension_semantics<parallel>, #tpu.dimension_semantics<parallel>, #tpu.dimension_semantics<arbitrary>], iteration_bounds = array<i64: 2, 1, 1>, scalar_prefetch = 0 : i64, scratch_operands = 1 : i64, tpu.core_type = #tpu.core_type<tc>, window_params = [{transform_indices = @transform_0, window_bounds = array<i64: 256, 128>}, {transform_indices = @transform_1, window_bounds = array<i64: 128, 128>}, {transform_indices = @transform_2, window_bounds = array<i64: 1, 128>}, {transform_indices = @transform_3, window_bounds = array<i64: 256, 128>}]} {
    %c0_i32 = arith.constant 0 : i32
    %0 = arith.cmpi eq, %arg2, %c0_i32 : i32
    %1 = arith.extui %0 : i1 to i32
    %c0_i32_0 = arith.constant 0 : i32
    %2 = arith.cmpi ne, %1, %c0_i32_0 : i32
    scf.if %2 {
      %cst_10 = arith.constant 0.000000e+00 : f32
      %12 = vector.broadcast %cst_10 : f32 to vector<256x128xf32>
      %c0_11 = arith.constant 0 : index
      %c0_12 = arith.constant 0 : index
      %13 = vector.load %arg7[%c0_11, %c0_12] : memref<256x128xf32, #tpu.memory_space<vmem>>, vector<256x128xf32>
      tpu.vector_store %arg7[%c0_11, %c0_12], %12 {strides = array<i32>} : memref<256x128xf32, #tpu.memory_space<vmem>>, vector<256x128xf32>,
    } else {
    }
    %c0 = arith.constant 0 : index
    %c0_1 = arith.constant 0 : index
    %3 = vector.load %arg7[%c0, %c0_1] : memref<256x128xf32, #tpu.memory_space<vmem>>, vector<256x128xf32>
    %c0_2 = arith.constant 0 : index
    %c0_3 = arith.constant 0 : index
    %4 = vector.load %arg3[%c0_2, %c0_3] : memref<256x128xbf16, #tpu.memory_space<vmem>>, vector<256x128xbf16>
    %c0_4 = arith.constant 0 : index
    %c0_5 = arith.constant 0 : index
    %5 = vector.load %arg4[%c0_4, %c0_5] : memref<128x128xbf16, #tpu.memory_space<vmem>>, vector<128x128xbf16>
    %cst = arith.constant dense<0.000000e+00> : vector<256x128xf32>
    %6 = tpu.matmul %4, %5, %cst {dimension_numbers = #tpu.dot_dimension_numbers<[1], [0], [0], [1], [0, 0, 1, 1], [], []>} : vector<256x128xbf16>, vector<128x128xbf16>, vector<256x128xf32> -> vector<256x128xf32>
    %7 = arith.addf %3, %6 : vector<256x128xf32>
    %c0_6 = arith.constant 0 : index
    %c0_7 = arith.constant 0 : index
    %8 = vector.load %arg7[%c0_6, %c0_7] : memref<256x128xf32, #tpu.memory_space<vmem>>, vector<256x128xf32>
    tpu.vector_store %arg7[%c0_6, %c0_7], %7 {strides = array<i32>} : memref<256x128xf32, #tpu.memory_space<vmem>>, vector<256x128xf32>,
    %c0_i32_8 = arith.constant 0 : i32
    %9 = arith.cmpi eq, %arg2, %c0_i32_8 : i32
    %10 = arith.extui %9 : i1 to i32
    %c0_i32_9 = arith.constant 0 : i32
    %11 = arith.cmpi ne, %10, %c0_i32_9 : i32
    scf.if %11 {
      %c0_10 = arith.constant 0 : index
      %c0_11 = arith.constant 0 : index
      %12 = vector.load %arg7[%c0_10, %c0_11] : memref<256x128xf32, #tpu.memory_space<vmem>>, vector<256x128xf32>
      %c0_12 = arith.constant 0 : index
      %c0_13 = arith.constant 0 : index
      %13 = vector.load %arg5[%c0_12, %c0_13] : memref<1x128xf32, #tpu.memory_space<vmem>>, vector<1x128xf32>
      %14 = vector.broadcast %13 : vector<1x128xf32> to vector<256x128xf32>
      %15 = arith.addf %12, %14 : vector<256x128xf32>
      %cst_14 = arith.constant 1.000000e+00 : f32
      %16 = vector.broadcast %cst_14 : f32 to vector<256x128xf32>
      %17 = arith.divf %15, %16 : vector<256x128xf32>
      %18 = math.roundeven %17 : vector<256x128xf32>
      %cst_15 = arith.constant 0.000000e+00 : f32
      %19 = vector.broadcast %cst_15 : f32 to vector<256x128xf32>
      %20 = arith.addf %18, %19 : vector<256x128xf32>
      %cst_16 = arith.constant 0.000000e+00 : f32
      %cst_17 = arith.constant 2.550000e+02 : f32
      %21 = vector.broadcast %cst_16 : f32 to vector<256x128xf32>
      %22 = arith.maximumf %21, %20 : vector<256x128xf32>
      %23 = vector.broadcast %cst_17 : f32 to vector<256x128xf32>
      %24 = arith.minimumf %23, %22 : vector<256x128xf32>
      %cst_18 = arith.constant 0.000000e+00 : f32
      %25 = vector.broadcast %cst_18 : f32 to vector<256x128xf32>
      %26 = arith.subf %24, %25 : vector<256x128xf32>
      %cst_19 = arith.constant 1.000000e+00 : f32
      %27 = vector.broadcast %cst_19 : f32 to vector<256x128xf32>
      %28 = arith.mulf %26, %27 : vector<256x128xf32>
      %c0_20 = arith.constant 0 : index
      %c0_21 = arith.constant 0 : index
      %29 = vector.load %arg6[%c0_20, %c0_21] : memref<256x128xf32, #tpu.memory_space<vmem>>, vector<256x128xf32>
      tpu.vector_store %arg6[%c0_20, %c0_21], %28 {strides = array<i32>} : memref<256x128xf32, #tpu.memory_space<vmem>>, vector<256x128xf32>,
    } else {
    }
    return
  }
  func.func @transform_0(%arg0: i32, %arg1: i32, %arg2: i32) -> (i32, i32) {
    %c0_i32 = arith.constant 0 : i32
    return %arg0, %arg2 : i32, i32
  }
  func.func @transform_1(%arg0: i32, %arg1: i32, %arg2: i32) -> (i32, i32) {
    %c0_i32 = arith.constant 0 : i32
    return %arg2, %arg1 : i32, i32
  }
  func.func @transform_2(%arg0: i32, %arg1: i32, %arg2: i32) -> (i32, i32) {
    %c0_i32 = arith.constant 0 : i32
    %c0_i32_0 = arith.constant 0 : i32
    return %c0_i32, %arg1 : i32, i32
  }
  func.func @transform_3(%arg0: i32, %arg1: i32, %arg2: i32) -> (i32, i32) {
    %c0_i32 = arith.constant 0 : i32
    return %arg0, %arg1 : i32, i32
  }
}

</mosaic_0001>

<bundles_post_ra>
// kernel: fn.1
= control target key start
LH: loop header
LB: loop body
LE: loop exit
PB: predicated region body
PF: predicated region fallthrough
CT: control target
= control target key end

     0   :  { %8 = vsyncpa [#allocation4], 0  ;;  %s1671_s0 = inlined_call_operand.vmem [shape: bf16[512,128], index: 0, kind: input, shape index: {}]   ;;  %s1672_s1 = inlined_call_operand.vmem [shape: bf16[128,128], index: 1, kind: input, shape index: {}]   ;;  %s1673_s2 = inlined_call_operand.vmem [shape: f32[1,128], index: 2, kind: input, shape index: {}]   ;;  %s1674_s3 = inlined_call_operand.hbm [shape: f32[512,128], index: 3, kind: output, shape index: {}]  }
   0x1   :  { %10 = vsyncpa [#allocation4 + $0x1], 0  ;;  %s1439_s12 = smov 0   ;;  %s1441_s13 = smov 0  }
   0x2   :  { %s1443_s14 = smov 0   ;;  %s1445_s15 = smov 0  }
   0x3   :  { %s1447_s16 = smov 0   ;;  %s1449_s17 = smov 0  }
   0x4 LB: > { %s1094_s18 = sadd.s32 4294967295, %s1414_s17   ;;  %s1095_s19 = sadd.s32 4294967294, %s1414_s17   ;;  %s1414_s17 = sphi %s1449_s17, %s16_s17   ;;  %s1410_s16 = sphi %s1447_s16, %s1681_s16   ;;  %s1406_s15 = sphi %s1445_s15, %s1680_s15   ;;  %s1402_s14 = sphi %s1443_s14, %s1679_s14   ;;  %s1398_s13 = sphi %s1441_s13, %s1678_s13   ;;  %s1394_s12 = sphi %s1439_s12, %s1677_s12  }
   0x5   : > { %s35_s20 = sadd.s32 1, %s1410_s16  ;;  %s126_s21 = sadd.s32 1, %s1402_s14 }
   0x6   : > { %p37_p0 = scmp.ge.s32.totalorder %s35_s20, 2  ;;  %p136_p1 = scmp.ne.s32.totalorder %s1402_s14, %s1398_s13 }
   0x7   : > { %p137_p2 = scmp.eq.s32.totalorder %s1094_s18, 1  ;;  %p142_p3 = scmp.ne.s32.totalorder %s1398_s13, %s1394_s12 }
   0x8   : > { %s1683_s20 = smov (%p37_p0, %s35_s20), 0  ;;  %p143_p5 = scmp.eq.s32.totalorder %s1095_s19, 1 }
   0x9   : > { %p1479_p4 = por %p137_p2, %p136_p1  ;;  %s121_s23 = ssub.s32 %s1410_s16, %s1683_s20 }
   0xa   : > { %p1100_p6 = scmp.ge.s32.totalorder %s1414_s17, 1  ;;  %p124_p7 = scmp.eq.s32.totalorder %s121_s23, 0 }
   0xb   : > { %p1486_p8 = por %p143_p5, %p142_p3  ;;  %p191_p9 = scmp.lt.s32.totalorder %s1414_s17, 3 }
   0xc   : > { %s1492_s25 = scalar_select %p124_p7, %s1402_s14, %s126_s21  }
   0xd   : > { %p192_p10 = pnand %p1100_p6, %p191_p9 }
   0xe   : > { %v1312_v0 = vld [vmem:[%s1672_s1] sm:$0xff] (!%p192_p10)   ;;  %s1102_s28 = sshll.u32 (!%p192_p10), %s1406_s15, 5  ;;  %v1313_v1 = vld [vmem:[%s1672_s1 + $0x8] sm:$0xff] (!%p192_p10)   ;;  %v1314_v2 = vld [vmem:[%s1672_s1 + $0x10] sm:$0xff] (!%p192_p10)   ;;  %s226_s5 = sand.u32 (!%p192_p10), 1, %s1398_s13  }
   0xf   : > { %195 = sbr.rel (%p192_p10) target bundleno = 309 (0x135), region = 32  ;;  %p230_p11 = scmp.lt.s32.totalorder (!%p192_p10), %s1102_s28, 63  ;;  %1159 = vmatprep.subr.bf16.mxu0 (!%p192_p10), %v1312_v0  ;;  %1207 = vmatprep.subr.bf16.mxu1 (!%p192_p10), %v1312_v0  ;;  %v1315_v3 = vld [vmem:[%s1672_s1 + $0x18] sm:$0xff] (!%p192_p10)   ;;  %v1316_v6 = vld [vmem:[%s1672_s1 + $0x20] sm:$0xff] (!%p192_p10)   ;;  %v1317_v7 = vld [vmem:[%s1672_s1 + $0x28] sm:$0xff] (!%p192_p10)  }
  0x10   : > { %1160 = vmatpush3.bf16.msra.mxu0 (!%p192_p10), %v1312_v0  ;;  %1215 = vmatpush3.bf16.msra.mxu1 (!%p192_p10), %v1312_v0  ;;  %v1318_v8 = vld [vmem:[%s1672_s1 + $0x30] sm:$0xff] (!%p192_p10)   ;;  %v1319_v9 = vld [vmem:[%s1672_s1 + $0x38] sm:$0xff] (!%p192_p10)   ;;  %v1543_v24 = vld [vmem:[%s1673_s2] ss:$0 sm:$0xff] (!%p192_p10)  ;;  %s1134_s8 = sshll.u32 (!%p192_p10), %s1406_s15, 12  ;;  %s1625_s18 = scalar_lea.sflag (!%p192_p10), [#allocation4], %s226_s5 }
  0x11   : > { %1161 = vmatprep.subr.bf16.mxu0 (!%p192_p10), %v1313_v1  ;;  %1208 = vmatprep.subr.bf16.mxu1 (!%p192_p10), %v1313_v1  ;;  %s1613_s11 = scalar_lea.hbm (!%p192_p10), %s1674_s3, %s1134_s8  ;;  %s1416_s21 = smov (!%p192_p10), [#allocation3]  }
  0x12   : > { %s1340_s23 = sshll.u32 (!%p192_p10), %s1416_s21, 4  ;;  %s1341_s23 = int_to_ptr.vmem [resolvable:$false] %s1340_s23 }
  0x13   : > { %s1342_s26 = scalar_lea.vmem (!%p192_p10), %s1341_s23, 8192 }
  0x14   : > { %1162 = vmatpush3.bf16.msra.mxu0 (!%p192_p10), %v1313_v1  ;;  %1216 = vmatpush3.bf16.msra.mxu1 (!%p192_p10), %v1313_v1 }
  0x15   : > { %1163 = vmatprep.subr.bf16.mxu0 (!%p192_p10), %v1314_v2  ;;  %1209 = vmatprep.subr.bf16.mxu1 (!%p192_p10), %v1314_v2 }
  0x16   : > { %s1685_s28 = smov (!%p230_p11, %s1102_s28), 63 }
  0x17   : > { %s1103_s6 = sshll.u32 %s1685_s28, 2 }
  0x18   : > { %s1507_s9 = scalar_lea.vmem %s1671_s0, %s1103_s6  ;;  %1164 = vmatpush3.bf16.msra.mxu0 %v1314_v2  ;;  %1217 = vmatpush3.bf16.msra.mxu1 %v1314_v2  ;;  %s1101_s6 = sshll.u32 %s226_s5, 8 }
  0x19   : > { %v1320_v4 = vld [vmem:[%s1507_s9] sm:$0xff]   ;;  %1165 = vmatprep.subr.bf16.mxu0 %v1315_v3  ;;  %1210 = vmatprep.subr.bf16.mxu1 %v1315_v3  ;;  %v1322_v10 = vld [vmem:[%s1507_s9 + $0x8] sm:$0xff]   ;;  %v1324_v12 = vld [vmem:[%s1507_s9 + $0x10] sm:$0xff]   ;;  %s1556_s7 = scalar_lea.vmem [#allocation3], %s1101_s6 }
  0x1a   : > { %v1321_v5 = vld [vmem:[%s1507_s9 + $0x40] sm:$0xff]   ;;  %1175 = vmatprep.mubr.bf16.mxu0 %v1320_v4  ;;  %v1323_v11 = vld [vmem:[%s1507_s9 + $0x48] sm:$0xff]   ;;  %v1325_v13 = vld [vmem:[%s1507_s9 + $0x50] sm:$0xff]  }
  0x1b   : > { %1191 = vmatprep.mubr.bf16.mxu1 %v1321_v5  ;;  %v1326_v14 = vld [vmem:[%s1507_s9 + $0x18] sm:$0xff]   ;;  %v1328_v16 = vld [vmem:[%s1507_s9 + $0x20] sm:$0xff]   ;;  %v1330_v18 = vld [vmem:[%s1507_s9 + $0x28] sm:$0xff]  }
  0x1c   : > { %1166 = vmatpush3.bf16.msra.mxu0 %v1315_v3  ;;  %1218 = vmatpush3.bf16.msra.mxu1 %v1315_v3  ;;  %v1327_v15 = vld [vmem:[%s1507_s9 + $0x58] sm:$0xff]   ;;  %v1329_v17 = vld [vmem:[%s1507_s9 + $0x60] sm:$0xff]   ;;  %v1331_v19 = vld [vmem:[%s1507_s9 + $0x68] sm:$0xff]  }
  0x1d   : > { %1167 = vmatprep.subr.bf16.mxu0 %v1316_v6  ;;  %1211 = vmatprep.subr.bf16.mxu1 %v1316_v6  ;;  %v1332_v20 = vld [vmem:[%s1507_s9 + $0x30] sm:$0xff]   ;;  %v1334_v22 = vld [vmem:[%s1507_s9 + $0x38] sm:$0xff]  }
  0x1e   : > { %v1333_v21 = vld [vmem:[%s1507_s9 + $0x70] sm:$0xff]   ;;  %v1335_v23 = vld [vmem:[%s1507_s9 + $0x78] sm:$0xff]   ;;  %s986_s9 = sshll.u32 %s1556_s7, 4  ;;  %s1615_s9 = int_to_ptr.vmem [resolvable:$true] %s986_s9 }
  0x1f   : > { %s1336_s19 = scalar_lea.vmem %s1615_s9, 4096  ;;  %p1343_p1 = scmp.lt.s32.totalorder %s1615_s9, %s1341_s23 }
  0x20   : > { %1168 = vmatpush3.bf16.msra.mxu0 %v1316_v6  ;;  %1219 = vmatpush3.bf16.msra.mxu1 %v1316_v6  ;;  %p1337_p12 = scmp.ne.s32.totalorder %s1615_s9, %s1336_s19  ;;  %p1344_p2 = scmp.lt.s32.totalorder %s1342_s26, %s1336_s19 }
  0x21   : > { %1169 = vmatprep.subr.bf16.mxu0 %v1317_v7  ;;  %1212 = vmatprep.subr.bf16.mxu1 %v1317_v7 }
  0x22   : > { %p1338_p13 = pnand %p1337_p12, %p1479_p4  ;;  %p1345_p3 = por %p1344_p2, %p1343_p1 }
  0x24   : > { %1170 = vmatpush3.bf16.msra.mxu0 %v1317_v7  ;;  %1220 = vmatpush3.bf16.msra.mxu1 %v1317_v7  ;;  %p1339_p0 = pneg %p1338_p13 }
  0x25   : > { %1171 = vmatprep.subr.bf16.mxu0 %v1318_v8  ;;  %1213 = vmatprep.subr.bf16.mxu1 %v1318_v8 }
  0x26   : > { %p1346_p5 = pnand %p1345_p3, %p1339_p0 }
  0x28   : > { %1172 = vmatpush3.bf16.msra.mxu0 %v1318_v8  ;;  %1221 = vmatpush3.bf16.msra.mxu1 %v1318_v8 }
  0x29   : > { %1173 = vmatprep.subr.bf16.mxu0 %v1319_v9  ;;  %1214 = vmatprep.subr.bf16.mxu1 %v1319_v9 }
  0x2c   : > { %1174 = vmatpush3.bf16.msra.mxu0 %v1319_v9  ;;  %1222 = vmatpush3.bf16.msra.mxu1 %v1319_v9 }
  0x2f   : > { %1176 = vmatmul.mubr.bf16.vlgmr.msra.gmra.mrb[0].mxu0 %v1322_v10  ;;  %1192 = vmatmul.mubr.bf16.vlgmr.msra.gmra.mrb[0].mxu1 %v1323_v11 }
  0x30   : > { %1179 = vmatprep.mubr.bf16.mxu0 %v1324_v12  ;;  %1195 = vmatprep.mubr.bf16.mxu1 %v1325_v13 }
  0x37   : > { %1180 = vmatmul.mubr.bf16.gmra.mrb[4].mxu0 %v1326_v14  ;;  %1196 = vmatmul.mubr.bf16.gmra.mrb[4].mxu1 %v1327_v15 }
  0x38   : > { %1183 = vmatprep.mubr.bf16.mxu0 %v1328_v16  ;;  %1199 = vmatprep.mubr.bf16.mxu1 %v1329_v17 }
  0x3f   : > { %1184 = vmatmul.mubr.bf16.gmra.mrb[8].mxu0 %v1330_v18  ;;  %1200 = vmatmul.mubr.bf16.gmra.mrb[8].mxu1 %v1331_v19 }
  0x40   : > { %1187 = vmatprep.mubr.bf16.mxu0 %v1332_v20  ;;  %1203 = vmatprep.mubr.bf16.mxu1 %v1333_v21 }
  0x47   : > { %1188 = vmatmul.mubr.bf16.gmra.mrb[12].mxu0 %v1334_v22  ;;  %1204 = vmatmul.mubr.bf16.gmra.mrb[12].mxu1 %v1335_v23 }
 0x102   : > { %v1177_v25 = vpop.f32.mrb[0].mxu0  ;;  %v1193_v26 = vpop.f32.mrb[0].mxu1 }
 0x103   : > { %v781_v27 = vadd.f32 %v1177_v25, %v1543_v24  ;;  %v797_v28 = vadd.f32 %v1193_v26, %v1543_v24  ;;  %v546_v29 = vpop.f32.mrb[1].mxu0  ;;  %v610_v30 = vpop.f32.mrb[1].mxu1 }
 0x104   : > { %v779_v31 = vadd.f32 %v1543_v24, %v546_v29  ;;  %v795_v32 = vadd.f32 %v1543_v24, %v610_v30  ;;  %v1178_v33 = vpop.f32.mrb[2].mxu0  ;;  %v1194_v34 = vpop.f32.mrb[2].mxu1 }
 0x105   : > { %v1225_v35 = vround.rtne.f32 %v781_v27  ;;  %v1241_v36 = vround.rtne.f32 %v797_v28  ;;  %v782_v37 = vadd.f32 %v1178_v33, %v1543_v24  ;;  %v798_v38 = vadd.f32 %v1194_v34, %v1543_v24  ;;  %v549_v39 = vpop.f32.mrb[3].mxu0  ;;  %v613_v40 = vpop.f32.mrb[3].mxu1 }
 0x106   : > { %v1223_v41 = vround.rtne.f32 %v779_v31  ;;  %v1239_v42 = vround.rtne.f32 %v795_v32  ;;  %v780_v43 = vadd.f32 %v1543_v24, %v549_v39  ;;  %v796_v44 = vadd.f32 %v1543_v24, %v613_v40 }
 0x107   : > { %v877_v45 = vmax.f32 %v1225_v35, 0.0  ;;  %v893_v46 = vmax.f32 %v1241_v36, 0.0  ;;  %v1226_v47 = vround.rtne.f32 %v782_v37  ;;  %v1242_v48 = vround.rtne.f32 %v798_v38 }
 0x108   : > { %v875_v49 = vmax.f32 %v1223_v41, 0.0  ;;  %v891_v50 = vmax.f32 %v1239_v42, 0.0  ;;  %v1224_v51 = vround.rtne.f32 %v780_v43  ;;  %v1240_v52 = vround.rtne.f32 %v796_v44 }
 0x109   : > { %v909_v53 = vmin.f32 %v877_v45, 255.0  ;;  %v925_v54 = vmin.f32 %v893_v46, 255.0  ;;  %v878_v55 = vmax.f32 %v1226_v47, 0.0  ;;  %v894_v56 = vmax.f32 %v1242_v48, 0.0 }
 0x10a   : > { %v907_v57 = vmin.f32 %v875_v49, 255.0  ;;  %v923_v58 = vmin.f32 %v891_v50, 255.0  ;;  %v876_v59 = vmax.f32 %v1224_v51, 0.0  ;;  %v892_v60 = vmax.f32 %v1240_v52, 0.0  ;;  %v1181_v61 = vpop.f32.mrb[4].mxu0  ;;  %v1197_v62 = vpop.f32.mrb[4].mxu1 }
 0x10b   : > { %941 = vst [vmem:[%s1556_s7 + $0x10] sm:$0xff] %v909_v53  ;;  %957 = vst [vmem:[%s1556_s7 + $0x90] sm:$0xff] %v925_v54  ;;  %v910_v63 = vmin.f32 %v878_v55, 255.0  ;;  %v926_v0 = vmin.f32 %v894_v56, 255.0  ;;  %v785_v1 = vadd.f32 %v1181_v61, %v1543_v24  ;;  %v801_v2 = vadd.f32 %v1197_v62, %v1543_v24  ;;  %v562_v3 = vpop.f32.mrb[5].mxu0  ;;  %v626_v4 = vpop.f32.mrb[5].mxu1 }
 0x10c   : > { %939 = vst [vmem:[%s1556_s7] sm:$0xff] %v907_v57  ;;  %955 = vst [vmem:[%s1556_s7 + $0x80] sm:$0xff] %v923_v58  ;;  %v908_v5 = vmin.f32 %v876_v59, 255.0  ;;  %v924_v6 = vmin.f32 %v892_v60, 255.0  ;;  %v783_v7 = vadd.f32 %v1543_v24, %v562_v3  ;;  %v799_v8 = vadd.f32 %v1543_v24, %v626_v4  ;;  %v1182_v9 = vpop.f32.mrb[6].mxu0  ;;  %v1198_v10 = vpop.f32.mrb[6].mxu1 }
 0x10d   : > { %942 = vst [vmem:[%s1556_s7 + $0x18] sm:$0xff] %v910_v63  ;;  %958 = vst [vmem:[%s1556_s7 + $0x98] sm:$0xff] %v926_v0  ;;  %v1229_v11 = vround.rtne.f32 %v785_v1  ;;  %v1245_v12 = vround.rtne.f32 %v801_v2  ;;  %v786_v13 = vadd.f32 %v1182_v9, %v1543_v24  ;;  %v802_v14 = vadd.f32 %v1198_v10, %v1543_v24  ;;  %v565_v15 = vpop.f32.mrb[7].mxu0  ;;  %v629_v16 = vpop.f32.mrb[7].mxu1 }
 0x10e   : > { %940 = vst [vmem:[%s1556_s7 + $0x8] sm:$0xff] %v908_v5  ;;  %956 = vst [vmem:[%s1556_s7 + $0x88] sm:$0xff] %v924_v6  ;;  %v1227_v17 = vround.rtne.f32 %v783_v7  ;;  %v1243_v18 = vround.rtne.f32 %v799_v8  ;;  %v784_v19 = vadd.f32 %v1543_v24, %v565_v15  ;;  %v800_v20 = vadd.f32 %v1543_v24, %v629_v16 }
 0x10f   : > { %v881_v21 = vmax.f32 %v1229_v11, 0.0  ;;  %v897_v22 = vmax.f32 %v1245_v12, 0.0  ;;  %v1230_v23 = vround.rtne.f32 %v786_v13  ;;  %v1246_v25 = vround.rtne.f32 %v802_v14 }
 0x110   : > { %v879_v26 = vmax.f32 %v1227_v17, 0.0  ;;  %v895_v27 = vmax.f32 %v1243_v18, 0.0  ;;  %v1228_v28 = vround.rtne.f32 %v784_v19  ;;  %v1244_v29 = vround.rtne.f32 %v800_v20 }
 0x111   : > { %v913_v30 = vmin.f32 %v881_v21, 255.0  ;;  %v929_v31 = vmin.f32 %v897_v22, 255.0  ;;  %v882_v32 = vmax.f32 %v1230_v23, 0.0  ;;  %v898_v33 = vmax.f32 %v1246_v25, 0.0 }
 0x112   : > { %v911_v34 = vmin.f32 %v879_v26, 255.0  ;;  %v927_v35 = vmin.f32 %v895_v27, 255.0  ;;  %v880_v36 = vmax.f32 %v1228_v28, 0.0  ;;  %v896_v37 = vmax.f32 %v1244_v29, 0.0  ;;  %v1185_v38 = vpop.f32.mrb[8].mxu0  ;;  %v1201_v39 = vpop.f32.mrb[8].mxu1 }
 0x113   : > { %945 = vst [vmem:[%s1556_s7 + $0x30] sm:$0xff] %v913_v30  ;;  %961 = vst [vmem:[%s1556_s7 + $0xb0] sm:$0xff] %v929_v31  ;;  %v914_v40 = vmin.f32 %v882_v32, 255.0  ;;  %v930_v41 = vmin.f32 %v898_v33, 255.0  ;;  %v789_v42 = vadd.f32 %v1185_v38, %v1543_v24  ;;  %v805_v43 = vadd.f32 %v1201_v39, %v1543_v24  ;;  %v578_v44 = vpop.f32.mrb[9].mxu0  ;;  %v642_v45 = vpop.f32.mrb[9].mxu1 }
 0x114   : > { %943 = vst [vmem:[%s1556_s7 + $0x20] sm:$0xff] %v911_v34  ;;  %959 = vst [vmem:[%s1556_s7 + $0xa0] sm:$0xff] %v927_v35  ;;  %v912_v46 = vmin.f32 %v880_v36, 255.0  ;;  %v928_v47 = vmin.f32 %v896_v37, 255.0  ;;  %v787_v48 = vadd.f32 %v1543_v24, %v578_v44  ;;  %v803_v49 = vadd.f32 %v1543_v24, %v642_v45  ;;  %v1186_v50 = vpop.f32.mrb[10].mxu0  ;;  %v1202_v51 = vpop.f32.mrb[10].mxu1 }
 0x115   : > { %946 = vst [vmem:[%s1556_s7 + $0x38] sm:$0xff] %v914_v40  ;;  %962 = vst [vmem:[%s1556_s7 + $0xb8] sm:$0xff] %v930_v41  ;;  %v1233_v52 = vround.rtne.f32 %v789_v42  ;;  %v1249_v53 = vround.rtne.f32 %v805_v43  ;;  %v790_v54 = vadd.f32 %v1186_v50, %v1543_v24  ;;  %v806_v55 = vadd.f32 %v1202_v51, %v1543_v24  ;;  %v581_v56 = vpop.f32.mrb[11].mxu0  ;;  %v645_v57 = vpop.f32.mrb[11].mxu1 }
 0x116   : > { %944 = vst [vmem:[%s1556_s7 + $0x28] sm:$0xff] %v912_v46  ;;  %960 = vst [vmem:[%s1556_s7 + $0xa8] sm:$0xff] %v928_v47  ;;  %v1231_v58 = vround.rtne.f32 %v787_v48  ;;  %v1247_v59 = vround.rtne.f32 %v803_v49  ;;  %v788_v60 = vadd.f32 %v1543_v24, %v581_v56  ;;  %v804_v61 = vadd.f32 %v1543_v24, %v645_v57 }
 0x117   : > { %v885_v62 = vmax.f32 %v1233_v52, 0.0  ;;  %v901_v63 = vmax.f32 %v1249_v53, 0.0  ;;  %v1234_v0 = vround.rtne.f32 %v790_v54  ;;  %v1250_v1 = vround.rtne.f32 %v806_v55 }
 0x118   : > { %v883_v2 = vmax.f32 %v1231_v58, 0.0  ;;  %v899_v3 = vmax.f32 %v1247_v59, 0.0  ;;  %v1232_v4 = vround.rtne.f32 %v788_v60  ;;  %v1248_v5 = vround.rtne.f32 %v804_v61 }
 0x119   : > { %v917_v6 = vmin.f32 %v885_v62, 255.0  ;;  %v933_v7 = vmin.f32 %v901_v63, 255.0  ;;  %v886_v8 = vmax.f32 %v1234_v0, 0.0  ;;  %v902_v9 = vmax.f32 %v1250_v1, 0.0 }
 0x11a   : > { %v915_v10 = vmin.f32 %v883_v2, 255.0  ;;  %v931_v11 = vmin.f32 %v899_v3, 255.0  ;;  %v884_v12 = vmax.f32 %v1232_v4, 0.0  ;;  %v900_v13 = vmax.f32 %v1248_v5, 0.0  ;;  %v1189_v14 = vpop.f32.mrb[12].mxu0  ;;  %v1205_v15 = vpop.f32.mrb[12].mxu1 }
 0x11b   : > { %949 = vst [vmem:[%s1556_s7 + $0x50] sm:$0xff] %v917_v6  ;;  %965 = vst [vmem:[%s1556_s7 + $0xd0] sm:$0xff] %v933_v7  ;;  %v918_v16 = vmin.f32 %v886_v8, 255.0  ;;  %v934_v17 = vmin.f32 %v902_v9, 255.0  ;;  %v793_v18 = vadd.f32 %v1189_v14, %v1543_v24  ;;  %v809_v19 = vadd.f32 %v1205_v15, %v1543_v24  ;;  %v594_v20 = vpop.f32.mrb[13].mxu0  ;;  %v658_v21 = vpop.f32.mrb[13].mxu1 }
 0x11c   : > { %947 = vst [vmem:[%s1556_s7 + $0x40] sm:$0xff] %v915_v10  ;;  %963 = vst [vmem:[%s1556_s7 + $0xc0] sm:$0xff] %v931_v11  ;;  %v916_v22 = vmin.f32 %v884_v12, 255.0  ;;  %v932_v23 = vmin.f32 %v900_v13, 255.0  ;;  %v791_v25 = vadd.f32 %v1543_v24, %v594_v20  ;;  %v807_v26 = vadd.f32 %v1543_v24, %v658_v21  ;;  %v1190_v27 = vpop.f32.mrb[14].mxu0  ;;  %v1206_v28 = vpop.f32.mrb[14].mxu1 }
 0x11d   : > { %950 = vst [vmem:[%s1556_s7 + $0x58] sm:$0xff] %v918_v16  ;;  %966 = vst [vmem:[%s1556_s7 + $0xd8] sm:$0xff] %v934_v17  ;;  %v1237_v29 = vround.rtne.f32 %v793_v18  ;;  %v1253_v30 = vround.rtne.f32 %v809_v19  ;;  %v794_v31 = vadd.f32 %v1190_v27, %v1543_v24  ;;  %v810_v32 = vadd.f32 %v1206_v28, %v1543_v24  ;;  %v597_v33 = vpop.f32.mrb[15].mxu0  ;;  %v661_v34 = vpop.f32.mrb[15].mxu1 }
 0x11e   : > { %948 = vst [vmem:[%s1556_s7 + $0x48] sm:$0xff] %v916_v22  ;;  %964 = vst [vmem:[%s1556_s7 + $0xc8] sm:$0xff] %v932_v23  ;;  %v1235_v35 = vround.rtne.f32 %v791_v25  ;;  %v1251_v36 = vround.rtne.f32 %v807_v26  ;;  %v792_v37 = vadd.f32 %v1543_v24, %v597_v33  ;;  %v808_v38 = vadd.f32 %v1543_v24, %v661_v34 }
 0x11f   : > { %v889_v39 = vmax.f32 %v1237_v29, 0.0  ;;  %v905_v40 = vmax.f32 %v1253_v30, 0.0  ;;  %v1238_v41 = vround.rtne.f32 %v794_v31  ;;  %v1254_v42 = vround.rtne.f32 %v810_v32 }
 0x120   : > { %v887_v43 = vmax.f32 %v1235_v35, 0.0  ;;  %v903_v44 = vmax.f32 %v1251_v36, 0.0  ;;  %v1236_v45 = vround.rtne.f32 %v792_v37  ;;  %v1252_v46 = vround.rtne.f32 %v808_v38 }
 0x121   : > { %v921_v47 = vmin.f32 %v889_v39, 255.0  ;;  %v937_v48 = vmin.f32 %v905_v40, 255.0  ;;  %v890_v49 = vmax.f32 %v1238_v41, 0.0  ;;  %v906_v50 = vmax.f32 %v1254_v42, 0.0 }
 0x122   : > { %v919_v24 = vmin.f32 %v887_v43, 255.0  ;;  %v935_v51 = vmin.f32 %v903_v44, 255.0  ;;  %v888_v52 = vmax.f32 %v1236_v45, 0.0  ;;  %v904_v53 = vmax.f32 %v1252_v46, 0.0 }
 0x123   : > { %953 = vst [vmem:[%s1556_s7 + $0x70] sm:$0xff] %v921_v47  ;;  %969 = vst [vmem:[%s1556_s7 + $0xf0] sm:$0xff] %v937_v48  ;;  %v922_v54 = vmin.f32 %v890_v49, 255.0  ;;  %v938_v55 = vmin.f32 %v906_v50, 255.0 }
 0x124   : > { %951 = vst [vmem:[%s1556_s7 + $0x60] sm:$0xff] %v919_v24  ;;  %967 = vst [vmem:[%s1556_s7 + $0xe0] sm:$0xff] %v935_v51  ;;  %v920_v56 = vmin.f32 %v888_v52, 255.0  ;;  %v936_v57 = vmin.f32 %v904_v53, 255.0 }
 0x125   : > { %954 = vst [vmem:[%s1556_s7 + $0x78] sm:$0xff] %v922_v54  ;;  %970 = vst [vmem:[%s1556_s7 + $0xf8] sm:$0xff] %v938_v55 }
 0x126   : > { %952 = vst [vmem:[%s1556_s7 + $0x68] sm:$0xff] %v920_v56  ;;  %968 = vst [vmem:[%s1556_s7 + $0xe8] sm:$0xff] %v936_v57 }
 0x127   : > { %1349 = shalt.err (!%p1346_p5)
}
 0x128   : > { %s1350_s27 = scalar_lea.hbm %s1613_s11, 4096  ;;  %s1354_s30 = scalar_lea.hbm %s1674_s3, 8192 }
 0x129   : > { %p1351_p6 = scmp.ne.s32.totalorder %s1613_s11, %s1350_s27  ;;  %p1355_p10 = scmp.lt.u32.totalorder %s1613_s11, %s1674_s3 }
 0x12a   : > { %p1356_p11 = scmp.lt.u32.totalorder %s1354_s30, %s1350_s27  ;;  %p1358_p13 = scmp.lt.u32.totalorder %s1350_s27, %s1613_s11 }
 0x12b   : > { %p1352_p7 = pnand %p1351_p6, %p1479_p4 }
 0x12c   : > { %p1357_p12 = por %p1356_p11, %p1355_p10 }
 0x12d   : > { %p1353_p9 = pneg %p1352_p7 }
 0x12e   : > { %p1359_p0 = por %p1358_p13, %p1357_p12 }
 0x130   : > { %p1360_p1 = pnand %p1359_p0, %p1353_p9 }
 0x132   : > { %1363 = shalt.err (!%p1360_p1)
}
 0x133   : > { %s1417_s6 = smov 128   ;;  %s1418_s7 = smov 8  }
 0x134   : > { %1255 = dma.vmem_to_hbm [thread:$0]  (%p1479_p4), %s1615_s9, 4096, %s1613_s11, %s1625_s18, %s1417_s6, %s1417_s6, %s1418_s7  }
 0x135 PF: > { %p1261_p2 = scmp.ge.s32.totalorder %s1414_s17, 2  ;;  %s1001_s8 = sand.u32 1, %s1394_s12  }
 0x136   : > { %s1002_s15 = scalar_lea.sflag [#allocation4], %s1001_s8 }
 0x137   : > { %p1258_p3 = pnand %p1261_p2, %p1486_p8 }
 0x139   : > { %1389 = dma.done.wait (!%p1258_p3), %s1002_s15, 4096  }
 0x13a   : > { %1391 = vsyncadd (!%p1258_p3), %s1002_s15, 4294963200  ;;  %s16_s17 = sadd.s32 1, %s1414_s17   ;;  %s1677_s12 = smov %s1398_s13 }
 0x13b   : > { %p13_p5 = scmp.ge.s32.totalorder %s16_s17, 4   ;;  %s1678_s13 = smov %s1402_s14 }
 0x13c   : > { %s1679_s14 = smov %s1492_s25  ;;  %s1680_s15 = smov %s1410_s16 }
 0x13d   : > { %s1681_s16 = smov %s1683_s20  ;;  %15 = sbr.rel (!%p13_p5) target bundleno = 4 (0x4), region = 81 }
 0x144   :  { %1007 = vsyncpa [#allocation4], 1 }
 0x145   :  { %1009 = vsyncpa [#allocation4 + $0x1], 1 }

</bundles_post_ra>
